<compile_context>
chip_gen: v7x
topology: tpu7x:2x2x1
jax: 0.10.0
libtpu: 0.0.40
codegen_flags: <defaults>
</compile_context>

<pallas_src>
import functools

import jax
import jax.numpy as jnp
from jax.experimental import pallas as pl
from jax.experimental.pallas import tpu as pltpu


_VMEM_LIMIT = 32 * 1024 * 1024  # conservative scoped-VMEM budget (v5e/v6e/v7x)


def _round_up(x, m):
    return (x + m - 1) // m * m


# ---------------------------------------------------------------------------
# Pallas kernels
# ---------------------------------------------------------------------------
def _gemm_bias_lrelu_kernel(a_ref, w_ref, b_ref, o_ref, acc_ref, *, leaky):
    """Tiled C = A @ W + bias (optionally fused LeakyReLU(0.2)).  Grid axis 2 = K."""
    k = pl.program_id(2)

    @pl.when(k == 0)
    def _():
        acc_ref[...] = jnp.zeros_like(acc_ref)

    acc_ref[...] += jnp.dot(a_ref[...], w_ref[...],
                            preferred_element_type=jnp.float32)

    @pl.when(k == pl.num_programs(2) - 1)
    def _():
        y = acc_ref[...] + b_ref[...]
        if leaky:
            y = jnp.where(y >= 0.0, y, 0.2 * y)
        o_ref[...] = y.astype(o_ref.dtype)


def _gemm_stats_kernel(a_ref, w_ref, o_ref, sum_ref, sq_ref, acc_ref):
    """Tiled C = A @ W; the epilogue also writes per-(row-tile) column sum and
    sum-of-squares so training-mode BatchNorm stats need no extra read of C."""
    k = pl.program_id(2)

    @pl.when(k == 0)
    def _():
        acc_ref[...] = jnp.zeros_like(acc_ref)

    acc_ref[...] += jnp.dot(a_ref[...], w_ref[...],
                            preferred_element_type=jnp.float32)

    @pl.when(k == pl.num_programs(2) - 1)
    def _():
        acc = acc_ref[...]
        o_ref[...] = acc.astype(o_ref.dtype)
        tn = acc.shape[1]
        col_sum = jnp.sum(acc, axis=0, keepdims=True)        # (1, TN)
        col_sq = jnp.sum(acc * acc, axis=0, keepdims=True)   # (1, TN)
        # Replicate across 8 sublanes so the stats blocks are (8,128)-aligned.
        sum_ref[...] = jnp.broadcast_to(col_sum, (8, tn))[None]
        sq_ref[...] = jnp.broadcast_to(col_sq, (8, tn))[None]


def _scale_shift_lrelu_kernel(x_ref, sc_ref, sh_ref, o_ref):
    """BatchNorm apply (precomputed per-channel scale/shift) + LeakyReLU(0.2)."""
    y = x_ref[...] * sc_ref[...] + sh_ref[...]
    o_ref[...] = jnp.where(y >= 0.0, y, 0.2 * y)


def _fc_matvec_kernel(x_ref, w_ref, o_ref, acc_ref):
    """out[b] = sum_k x[b,k]*w[k]: VPU multiply + lane reduce (no 1-lane MXU GEMM)."""
    k = pl.program_id(0)

    @pl.when(k == 0)
    def _():
        acc_ref[...] = jnp.zeros_like(acc_ref)

    acc_ref[...] += jnp.sum(x_ref[...] * w_ref[...], axis=1, keepdims=True)

    @pl.when(k == pl.num_programs(0) - 1)
    def _():
        o_ref[...] = acc_ref[...]


# ---------------------------------------------------------------------------
# Pallas wrappers (tiling / padding / dtype plumbing)
# ---------------------------------------------------------------------------
def _gemm_tiles(M, N, K):
    TM = min(512, _round_up(M, 16))
    TN = min(256, _round_up(N, 128))
    TK = min(512, _round_up(K, 128))
    return TM, TN, TK, _round_up(M, TM), _round_up(N, TN), _round_up(K, TK)


def _pad2(x, rows, cols):
    r, c = x.shape
    return jnp.pad(x, ((0, rows - r), (0, cols - c)))


def conv_gemm_bias_lrelu(a, w, bias, *, leaky=True):
    """a:(M,K) f32, w:(K,N) f32, bias:(N,) f32 -> (M,N) f32 [+LeakyReLU(0.2)]."""
    M, K = a.shape
    _, N = w.shape
    TM, TN, TK, Mp, Np, Kp = _gemm_tiles(M, N, K)
    a_p = _pad2(a, Mp, Kp).astype(jnp.bfloat16)   # bf16 MXU operands
    w_p = _pad2(w, Kp, Np).astype(jnp.bfloat16)
    b_p = jnp.pad(bias, (0, Np - N)).reshape(1, Np).astype(jnp.float32)

    y = pl.pallas_call(
        functools.partial(_gemm_bias_lrelu_kernel, leaky=leaky),
        out_shape=jax.ShapeDtypeStruct((Mp, Np), jnp.float32),
        grid_spec=pltpu.PrefetchScalarGridSpec(
            num_scalar_prefetch=0,
            grid=(Mp // TM, Np // TN, Kp // TK),
            in_specs=[pl.BlockSpec((TM, TK), lambda i, j, k: (i, k)),
                      pl.BlockSpec((TK, TN), lambda i, j, k: (k, j)),
                      pl.BlockSpec((1, TN), lambda i, j, k: (0, j))],
            out_specs=pl.BlockSpec((TM, TN), lambda i, j, k: (i, j)),
            scratch_shapes=[pltpu.VMEM((TM, TN), jnp.float32)]),
        compiler_params=pltpu.CompilerParams(
            dimension_semantics=("parallel", "parallel", "arbitrary"),
            vmem_limit_bytes=_VMEM_LIMIT),
    )(a_p, w_p, b_p)
    return y[:M, :N]


def conv_gemm_with_stats(a, w):
    """Conv GEMM (no bias) + per-channel sum / sum-of-squares for BatchNorm.

    Returns (y_padded (Mp,Np) f32, col_sum (N,), col_sq (N,), (TM, TN)).
    Zero-padded rows/cols contribute 0 to the sums, so dividing by the true M
    outside gives exact batch statistics.
    """
    M, K = a.shape
    _, N = w.shape
    TM, TN, TK, Mp, Np, Kp = _gemm_tiles(M, N, K)
    nm = Mp // TM
    a_p = _pad2(a, Mp, Kp).astype(jnp.bfloat16)
    w_p = _pad2(w, Kp, Np).astype(jnp.bfloat16)

    y, s, sq = pl.pallas_call(
        _gemm_stats_kernel,
        out_shape=(jax.ShapeDtypeStruct((Mp, Np), jnp.float32),
                   jax.ShapeDtypeStruct((nm, 8, Np), jnp.float32),
                   jax.ShapeDtypeStruct((nm, 8, Np), jnp.float32)),
        grid_spec=pltpu.PrefetchScalarGridSpec(
            num_scalar_prefetch=0,
            grid=(nm, Np // TN, Kp // TK),
            in_specs=[pl.BlockSpec((TM, TK), lambda i, j, k: (i, k)),
                      pl.BlockSpec((TK, TN), lambda i, j, k: (k, j))],
            out_specs=(pl.BlockSpec((TM, TN), lambda i, j, k: (i, j)),
                       pl.BlockSpec((1, 8, TN), lambda i, j, k: (i, 0, j)),
                       pl.BlockSpec((1, 8, TN), lambda i, j, k: (i, 0, j))),
            scratch_shapes=[pltpu.VMEM((TM, TN), jnp.float32)]),
        compiler_params=pltpu.CompilerParams(
            dimension_semantics=("parallel", "parallel", "arbitrary"),
            vmem_limit_bytes=_VMEM_LIMIT),
    )(a_p, w_p)

    col_sum = s[:, 0, :N].sum(axis=0)   # rows are sublane replicas -> take row 0
    col_sq = sq[:, 0, :N].sum(axis=0)
    return y, col_sum, col_sq, (TM, TN)


def bn_lrelu_apply(y_pad, scale, shift, TM, TN):
    """y*scale + shift then LeakyReLU(0.2), tiled over (row, channel) blocks."""
    Mp, Np = y_pad.shape
    N = scale.shape[0]
    sc = jnp.pad(scale, (0, Np - N)).reshape(1, Np).astype(jnp.float32)
    sh = jnp.pad(shift, (0, Np - N)).reshape(1, Np).astype(jnp.float32)
    return pl.pallas_call(
        _scale_shift_lrelu_kernel,
        out_shape=jax.ShapeDtypeStruct((Mp, Np), jnp.float32),
        grid_spec=pltpu.PrefetchScalarGridSpec(
            num_scalar_prefetch=0,
            grid=(Mp // TM, Np // TN),
            in_specs=[pl.BlockSpec((TM, TN), lambda i, j: (i, j)),
                      pl.BlockSpec((1, TN), lambda i, j: (0, j)),
                      pl.BlockSpec((1, TN), lambda i, j: (0, j))],
            out_specs=pl.BlockSpec((TM, TN), lambda i, j: (i, j))),
        compiler_params=pltpu.CompilerParams(
            dimension_semantics=("parallel", "parallel"),
            vmem_limit_bytes=_VMEM_LIMIT),
    )(y_pad, sc, sh)


def fc_matvec(x, w_row, b):
    """x:(B,K) f32, w_row:(1,K) f32, b:(1,) -> (B,1) f32 (row-reduction matvec)."""
    B, K = x.shape
    TK = min(2048, _round_up(K, 128))
    Kp = _round_up(K, TK)
    Bp = _round_up(B, 8)
    x_p = _pad2(x, Bp, Kp)
    w_p = _pad2(w_row, 1, Kp)

    out = pl.pallas_call(
        _fc_matvec_kernel,
        out_shape=jax.ShapeDtypeStruct((Bp, 1), jnp.float32),
        grid_spec=pltpu.PrefetchScalarGridSpec(
            num_scalar_prefetch=0,
            grid=(Kp // TK,),
            in_specs=[pl.BlockSpec((Bp, TK), lambda k: (0, k)),
                      pl.BlockSpec((1, TK), lambda k: (0, k))],
            out_specs=pl.BlockSpec((Bp, 1), lambda k: (0, 0)),
            scratch_shapes=[pltpu.VMEM((Bp, 1), jnp.float32)]),
        compiler_params=pltpu.CompilerParams(
            dimension_semantics=("arbitrary",),
            vmem_limit_bytes=_VMEM_LIMIT),
    )(x_p, w_p)
    return out[:B, :] + b.reshape(1, 1)


# ---------------------------------------------------------------------------
# Plain-JAX glue
# ---------------------------------------------------------------------------
def im2col_channel_last(h, kernel=4, stride=2, pad=1):
    """h: (B, L, C) channel-last -> patches (B*L_out, kernel*C) via strided slices
    (no gather).  Patch element order is (k, c), matching w.transpose(2,1,0)."""
    B, L, C = h.shape
    L_out = (L + 2 * pad - kernel) // stride + 1
    hp = jnp.pad(h, ((0, 0), (pad, pad), (0, 0)))
    taps = [jax.lax.slice(hp, (0, k, 0),
                          (B, k + stride * (L_out - 1) + 1, C),
                          (1, stride, 1))
            for k in range(kernel)]                     # each (B, L_out, C)
    patches = jnp.stack(taps, axis=2)                   # (B, L_out, K, C)
    return patches.reshape(B * L_out, kernel * C), L_out


def init_params(key, in_channels, base_channels, signal_length):
    """PyTorch-default-shaped init (uniform +/- 1/sqrt(fan_in))."""
    chans = [in_channels, base_channels, base_channels * 2,
             base_channels * 4, base_channels * 8]
    params = {}
    keys = jax.random.split(key, 16)
    ki = 0
    for i in range(4):
        cin, cout = chans[i], chans[i + 1]
        bound = 1.0 / jnp.sqrt(cin * 4.0)
        params[f"conv{i}_w"] = jax.random.uniform(
            keys[ki], (cout, cin, 4), jnp.float32, -bound, bound); ki += 1
        params[f"conv{i}_b"] = jax.random.uniform(
            keys[ki], (cout,), jnp.float32, -bound, bound); ki += 1
        if i > 0:  # BatchNorm after convs 2, 3, 4 (training mode: gamma=1, beta=0)
            params[f"bn{i}_gamma"] = jnp.ones((cout,), jnp.float32)
            params[f"bn{i}_beta"] = jnp.zeros((cout,), jnp.float32)
    final_len = signal_length // 16
    fc_in = chans[4] * final_len
    bound = 1.0 / jnp.sqrt(float(fc_in))
    params["fc_w"] = jax.random.uniform(keys[ki], (1, fc_in), jnp.float32,
                                        -bound, bound); ki += 1
    params["fc_b"] = jax.random.uniform(keys[ki], (1,), jnp.float32, -bound, bound)
    return params


def ecg_discriminator_forward(params, x):
    """x: (B, C_in, L) float32  ->  (B, 1) float32."""
    B = x.shape[0]
    # channel-last once; all Pallas slabs are (rows = B*L, lanes = channels)
    h = jnp.transpose(x, (0, 2, 1))                     # (B, L, C_in)
    for i in range(4):
        a, L_out = im2col_channel_last(h)               # (B*L_out, 4*C)
        w = params[f"conv{i}_w"]                        # (C_out, C_in, 4)
        cout = w.shape[0]
        wmat = jnp.transpose(w, (2, 1, 0)).reshape(-1, cout)   # (4*C_in, C_out)
        M = B * L_out
        if i == 0:
            # Conv1d + bias + LeakyReLU(0.2) fused in one tiled GEMM
            y = conv_gemm_bias_lrelu(a, wmat, params["conv0_b"], leaky=True)
        else:
            # Conv bias dropped: per-channel constants cancel exactly under
            # training-mode BatchNorm (batch statistics).
            y_pad, col_sum, col_sq, (TM, TN) = conv_gemm_with_stats(a, wmat)
            mean = col_sum / M
            var = col_sq / M - mean * mean              # biased batch variance
            gamma = params[f"bn{i}_gamma"]
            beta = params[f"bn{i}_beta"]
            scale = gamma * jax.lax.rsqrt(var + 1e-5)
            shift = beta - mean * scale
            y = bn_lrelu_apply(y_pad, scale, shift, TM, TN)[:M, :cout]
        h = y.reshape(B, L_out, cout)                   # stay channel-last
    # PyTorch `out.view(B, -1)` flattens the NCL tensor channel-major (c*L + l)
    flat = jnp.transpose(h, (0, 2, 1)).reshape(B, -1)
    return fc_matvec(flat, params["fc_w"], params["fc_b"])


# ---------------------------------------------------------------------------
if __name__ == "__main__":
    key = jax.random.PRNGKey(0)
    kp, kx = jax.random.split(key)

    # Small shapes consistent with the module: signal length divisible by 16.
    batch, in_channels, base_channels, signal_length = 2, 4, 8, 32

    params = init_params(kp, in_channels, base_channels, signal_length)
    x = jax.random.normal(kx, (batch, in_channels, signal_length), jnp.float32)

    fwd = jax.jit(ecg_discriminator_forward)
    out = jax.block_until_ready(fwd(params, x))

    assert out.shape == (batch, 1), out.shape
    assert bool(jnp.all(jnp.isfinite(out)))
    print("KERNEL_OK")
</pallas_src>

<mosaic_0001>
module attributes {stable_mosaic.version = 11 : i64} {
  func.func @_gemm_bias_lrelu_kernel(%arg0: i32, %arg1: i32, %arg2: i32, %arg3: memref<32x128xbf16, #tpu.memory_space<vmem>>, %arg4: memref<128x128xbf16, #tpu.memory_space<vmem>>, %arg5: memref<1x128xf32, #tpu.memory_space<vmem>>, %arg6: memref<32x128xf32, #tpu.memory_space<vmem>>, %arg7: memref<32x128xf32, #tpu.memory_space<vmem>>) attributes {dimension_semantics = [#tpu.dimension_semantics<parallel>, #tpu.dimension_semantics<parallel>, #tpu.dimension_semantics<arbitrary>], iteration_bounds = array<i64: 1, 1, 1>, scalar_prefetch = 0 : i64, scratch_operands = 1 : i64, tpu.core_type = #tpu.core_type<tc>, window_params = [{transform_indices = @transform_0, window_bounds = array<i64: 32, 128>}, {transform_indices = @transform_1, window_bounds = array<i64: 128, 128>}, {transform_indices = @transform_2, window_bounds = array<i64: 1, 128>}, {transform_indices = @transform_3, window_bounds = array<i64: 32, 128>}]} {
    %c0_i32 = arith.constant 0 : i32
    %0 = arith.cmpi eq, %arg2, %c0_i32 : i32
    %1 = arith.extui %0 : i1 to i32
    %c0_i32_0 = arith.constant 0 : i32
    %2 = arith.cmpi ne, %1, %c0_i32_0 : i32
    scf.if %2 {
      %cst_10 = arith.constant 0.000000e+00 : f32
      %12 = vector.broadcast %cst_10 : f32 to vector<32x128xf32>
      %c0_11 = arith.constant 0 : index
      %c0_12 = arith.constant 0 : index
      %13 = vector.load %arg7[%c0_11, %c0_12] : memref<32x128xf32, #tpu.memory_space<vmem>>, vector<32x128xf32>
      tpu.vector_store %arg7[%c0_11, %c0_12], %12 {strides = array<i32>} : memref<32x128xf32, #tpu.memory_space<vmem>>, vector<32x128xf32>,
    } else {
    }
    %c0 = arith.constant 0 : index
    %c0_1 = arith.constant 0 : index
    %3 = vector.load %arg7[%c0, %c0_1] : memref<32x128xf32, #tpu.memory_space<vmem>>, vector<32x128xf32>
    %c0_2 = arith.constant 0 : index
    %c0_3 = arith.constant 0 : index
    %4 = vector.load %arg3[%c0_2, %c0_3] : memref<32x128xbf16, #tpu.memory_space<vmem>>, vector<32x128xbf16>
    %c0_4 = arith.constant 0 : index
    %c0_5 = arith.constant 0 : index
    %5 = vector.load %arg4[%c0_4, %c0_5] : memref<128x128xbf16, #tpu.memory_space<vmem>>, vector<128x128xbf16>
    %cst = arith.constant dense<0.000000e+00> : vector<32x128xf32>
    %6 = tpu.matmul %4, %5, %cst {dimension_numbers = #tpu.dot_dimension_numbers<[1], [0], [0], [1], [0, 0, 1, 1], [], []>} : vector<32x128xbf16>, vector<128x128xbf16>, vector<32x128xf32> -> vector<32x128xf32>
    %7 = arith.addf %3, %6 : vector<32x128xf32>
    %c0_6 = arith.constant 0 : index
    %c0_7 = arith.constant 0 : index
    %8 = vector.load %arg7[%c0_6, %c0_7] : memref<32x128xf32, #tpu.memory_space<vmem>>, vector<32x128xf32>
    tpu.vector_store %arg7[%c0_6, %c0_7], %7 {strides = array<i32>} : memref<32x128xf32, #tpu.memory_space<vmem>>, vector<32x128xf32>,
    %c0_i32_8 = arith.constant 0 : i32
    %9 = arith.cmpi eq, %arg2, %c0_i32_8 : i32
    %10 = arith.extui %9 : i1 to i32
    %c0_i32_9 = arith.constant 0 : i32
    %11 = arith.cmpi ne, %10, %c0_i32_9 : i32
    scf.if %11 {
      %c0_10 = arith.constant 0 : index
      %c0_11 = arith.constant 0 : index
      %12 = vector.load %arg7[%c0_10, %c0_11] : memref<32x128xf32, #tpu.memory_space<vmem>>, vector<32x128xf32>
      %c0_12 = arith.constant 0 : index
      %c0_13 = arith.constant 0 : index
      %13 = vector.load %arg5[%c0_12, %c0_13] : memref<1x128xf32, #tpu.memory_space<vmem>>, vector<1x128xf32>
      %14 = vector.broadcast %13 : vector<1x128xf32> to vector<32x128xf32>
      %15 = arith.addf %12, %14 : vector<32x128xf32>
      %cst_14 = arith.constant 0.000000e+00 : f32
      %16 = vector.broadcast %cst_14 : f32 to vector<32x128xf32>
      %17 = arith.cmpf oge, %15, %16 : vector<32x128xf32>
      %cst_15 = arith.constant 2.000000e-01 : f32
      %18 = vector.broadcast %cst_15 : f32 to vector<32x128xf32>
      %19 = arith.mulf %18, %15 : vector<32x128xf32>
      %20 = arith.select %17, %15, %19 : vector<32x128xi1>, vector<32x128xf32>
      %c0_16 = arith.constant 0 : index
      %c0_17 = arith.constant 0 : index
      %21 = vector.load %arg6[%c0_16, %c0_17] : memref<32x128xf32, #tpu.memory_space<vmem>>, vector<32x128xf32>
      tpu.vector_store %arg6[%c0_16, %c0_17], %20 {strides = array<i32>} : memref<32x128xf32, #tpu.memory_space<vmem>>, vector<32x128xf32>,
    } else {
    }
    return
  }
  func.func @transform_0(%arg0: i32, %arg1: i32, %arg2: i32) -> (i32, i32) {
    %c0_i32 = arith.constant 0 : i32
    return %arg0, %arg2 : i32, i32
  }
  func.func @transform_1(%arg0: i32, %arg1: i32, %arg2: i32) -> (i32, i32) {
    %c0_i32 = arith.constant 0 : i32
    return %arg2, %arg1 : i32, i32
  }
  func.func @transform_2(%arg0: i32, %arg1: i32, %arg2: i32) -> (i32, i32) {
    %c0_i32 = arith.constant 0 : i32
    %c0_i32_0 = arith.constant 0 : i32
    return %c0_i32, %arg1 : i32, i32
  }
  func.func @transform_3(%arg0: i32, %arg1: i32, %arg2: i32) -> (i32, i32) {
    %c0_i32 = arith.constant 0 : i32
    return %arg0, %arg1 : i32, i32
  }
}

module attributes {stable_mosaic.version = 11 : i64} {
  func.func @_gemm_stats_kernel(%arg0: i32, %arg1: i32, %arg2: i32, %arg3: memref<16x128xbf16, #tpu.memory_space<vmem>>, %arg4: memref<128x128xbf16, #tpu.memory_space<vmem>>, %arg5: memref<16x128xf32, #tpu.memory_space<vmem>>, %arg6: memref<1x8x128xf32, #tpu.memory_space<vmem>>, %arg7: memref<1x8x128xf32, #tpu.memory_space<vmem>>, %arg8: memref<16x128xf32, #tpu.memory_space<vmem>>) attributes {dimension_semantics = [#tpu.dimension_semantics<parallel>, #tpu.dimension_semantics<parallel>, #tpu.dimension_semantics<arbitrary>], iteration_bounds = array<i64: 1, 1, 1>, scalar_prefetch = 0 : i64, scratch_operands = 1 : i64, tpu.core_type = #tpu.core_type<tc>, window_params = [{transform_indices = @transform_0, window_bounds = array<i64: 16, 128>}, {transform_indices = @transform_1, window_bounds = array<i64: 128, 128>}, {transform_indices = @transform_2, window_bounds = array<i64: 16, 128>}, {transform_indices = @transform_3, window_bounds = array<i64: 1, 8, 128>}, {transform_indices = @transform_4, window_bounds = array<i64: 1, 8, 128>}]} {
    %c0_i32 = arith.constant 0 : i32
    %0 = arith.cmpi eq, %arg2, %c0_i32 : i32
    %1 = arith.extui %0 : i1 to i32
    %c0_i32_0 = arith.constant 0 : i32
    %2 = arith.cmpi ne, %1, %c0_i32_0 : i32
    scf.if %2 {
      %cst_10 = arith.constant 0.000000e+00 : f32
      %12 = vector.broadcast %cst_10 : f32 to vector<16x128xf32>
      %c0_11 = arith.constant 0 : index
      %c0_12 = arith.constant 0 : index
      %13 = vector.load %arg8[%c0_11, %c0_12] : memref<16x128xf32, #tpu.memory_space<vmem>>, vector<16x128xf32>
      tpu.vector_store %arg8[%c0_11, %c0_12], %12 {strides = array<i32>} : memref<16x128xf32, #tpu.memory_space<vmem>>, vector<16x128xf32>,
    } else {
    }
    %c0 = arith.constant 0 : index
    %c0_1 = arith.constant 0 : index
    %3 = vector.load %arg8[%c0, %c0_1] : memref<16x128xf32, #tpu.memory_space<vmem>>, vector<16x128xf32>
    %c0_2 = arith.constant 0 : index
    %c0_3 = arith.constant 0 : index
    %4 = vector.load %arg3[%c0_2, %c0_3] : memref<16x128xbf16, #tpu.memory_space<vmem>>, vector<16x128xbf16>
    %c0_4 = arith.constant 0 : index
    %c0_5 = arith.constant 0 : index
    %5 = vector.load %arg4[%c0_4, %c0_5] : memref<128x128xbf16, #tpu.memory_space<vmem>>, vector<128x128xbf16>
    %cst = arith.constant dense<0.000000e+00> : vector<16x128xf32>
    %6 = tpu.matmul %4, %5, %cst {dimension_numbers = #tpu.dot_dimension_numbers<[1], [0], [0], [1], [0, 0, 1, 1], [], []>} : vector<16x128xbf16>, vector<128x128xbf16>, vector<16x128xf32> -> vector<16x128xf32>
    %7 = arith.addf %3, %6 : vector<16x128xf32>
    %c0_6 = arith.constant 0 : index
    %c0_7 = arith.constant 0 : index
    %8 = vector.load %arg8[%c0_6, %c0_7] : memref<16x128xf32, #tpu.memory_space<vmem>>, vector<16x128xf32>
    tpu.vector_store %arg8[%c0_6, %c0_7], %7 {strides = array<i32>} : memref<16x128xf32, #tpu.memory_space<vmem>>, vector<16x128xf32>,
    %c0_i32_8 = arith.constant 0 : i32
    %9 = arith.cmpi eq, %arg2, %c0_i32_8 : i32
    %10 = arith.extui %9 : i1 to i32
    %c0_i32_9 = arith.constant 0 : i32
    %11 = arith.cmpi ne, %10, %c0_i32_9 : i32
    scf.if %11 {
      %c0_10 = arith.constant 0 : index
      %c0_11 = arith.constant 0 : index
      %12 = vector.load %arg8[%c0_10, %c0_11] : memref<16x128xf32, #tpu.memory_space<vmem>>, vector<16x128xf32>
      %c0_12 = arith.constant 0 : index
      %c0_13 = arith.constant 0 : index
      %13 = vector.load %arg5[%c0_12, %c0_13] : memref<16x128xf32, #tpu.memory_space<vmem>>, vector<16x128xf32>
      tpu.vector_store %arg5[%c0_12, %c0_13], %12 {strides = array<i32>} : memref<16x128xf32, #tpu.memory_space<vmem>>, vector<16x128xf32>,
      %cst_14 = arith.constant dense<0.000000e+00> : vector<128xf32>
      %14 = vector.multi_reduction <add>, %12, %cst_14 [0] : vector<16x128xf32> to vector<128xf32>
      %15 = vector.shape_cast %14 : vector<128xf32> to vector<1x128xf32>
      %16 = arith.mulf %12, %12 : vector<16x128xf32>
      %cst_15 = arith.constant dense<0.000000e+00> : vector<128xf32>
      %17 = vector.multi_reduction <add>, %16, %cst_15 [0] : vector<16x128xf32> to vector<128xf32>
      %18 = vector.shape_cast %17 : vector<128xf32> to vector<1x128xf32>
      %19 = vector.shape_cast %15 : vector<1x128xf32> to vector<1x128xf32>
      %20 = vector.broadcast %19 : vector<1x128xf32> to vector<8x128xf32>
      %21 = vector.shape_cast %20 : vector<8x128xf32> to vector<1x8x128xf32>
      %c0_16 = arith.constant 0 : index
      %c0_17 = arith.constant 0 : index
      %c0_18 = arith.constant 0 : index
      %22 = vector.load %arg6[%c0_16, %c0_17, %c0_18] : memref<1x8x128xf32, #tpu.memory_space<vmem>>, vector<1x8x128xf32>
      tpu.vector_store %arg6[%c0_16, %c0_17, %c0_18], %21 {strides = array<i32>} : memref<1x8x128xf32, #tpu.memory_space<vmem>>, vector<1x8x128xf32>,
      %23 = vector.shape_cast %18 : vector<1x128xf32> to vector<1x128xf32>
      %24 = vector.broadcast %23 : vector<1x128xf32> to vector<8x128xf32>
      %25 = vector.shape_cast %24 : vector<8x128xf32> to vector<1x8x128xf32>
      %c0_19 = arith.constant 0 : index
      %c0_20 = arith.constant 0 : index
      %c0_21 = arith.constant 0 : index
      %26 = vector.load %arg7[%c0_19, %c0_20, %c0_21] : memref<1x8x128xf32, #tpu.memory_space<vmem>>, vector<1x8x128xf32>
      tpu.vector_store %arg7[%c0_19, %c0_20, %c0_21], %25 {strides = array<i32>} : memref<1x8x128xf32, #tpu.memory_space<vmem>>, vector<1x8x128xf32>,
    } else {
    }
    return
  }
  func.func @transform_0(%arg0: i32, %arg1: i32, %arg2: i32) -> (i32, i32) {
    %c0_i32 = arith.constant 0 : i32
    return %arg0, %arg2 : i32, i32
  }
  func.func @transform_1(%arg0: i32, %arg1: i32, %arg2: i32) -> (i32, i32) {
    %c0_i32 = arith.constant 0 : i32
    return %arg2, %arg1 : i32, i32
  }
  func.func @transform_2(%arg0: i32, %arg1: i32, %arg2: i32) -> (i32, i32) {
    %c0_i32 = arith.constant 0 : i32
    return %arg0, %arg1 : i32, i32
  }
  func.func @transform_3(%arg0: i32, %arg1: i32, %arg2: i32) -> (i32, i32, i32) {
    %c0_i32 = arith.constant 0 : i32
    %c0_i32_0 = arith.constant 0 : i32
    return %arg0, %c0_i32, %arg1 : i32, i32, i32
  }
  func.func @transform_4(%arg0: i32, %arg1: i32, %arg2: i32) -> (i32, i32, i32) {
    %c0_i32 = arith.constant 0 : i32
    %c0_i32_0 = arith.constant 0 : i32
    return %arg0, %c0_i32, %arg1 : i32, i32, i32
  }
}

module attributes {stable_mosaic.version = 11 : i64} {
  func.func @_scale_shift_lrelu_kernel(%arg0: i32, %arg1: i32, %arg2: memref<16x128xf32, #tpu.memory_space<vmem>>, %arg3: memref<1x128xf32, #tpu.memory_space<vmem>>, %arg4: memref<1x128xf32, #tpu.memory_space<vmem>>, %arg5: memref<16x128xf32, #tpu.memory_space<vmem>>) attributes {dimension_semantics = [#tpu.dimension_semantics<parallel>, #tpu.dimension_semantics<parallel>], iteration_bounds = array<i64: 1, 1>, scalar_prefetch = 0 : i64, scratch_operands = 0 : i64, tpu.core_type = #tpu.core_type<tc>, window_params = [{transform_indices = @transform_0, window_bounds = array<i64: 16, 128>}, {transform_indices = @transform_1, window_bounds = array<i64: 1, 128>}, {transform_indices = @transform_2, window_bounds = array<i64: 1, 128>}, {transform_indices = @transform_3, window_bounds = array<i64: 16, 128>}]} {
    %c0 = arith.constant 0 : index
    %c0_0 = arith.constant 0 : index
    %0 = vector.load %arg2[%c0, %c0_0] : memref<16x128xf32, #tpu.memory_space<vmem>>, vector<16x128xf32>
    %c0_1 = arith.constant 0 : index
    %c0_2 = arith.constant 0 : index
    %1 = vector.load %arg3[%c0_1, %c0_2] : memref<1x128xf32, #tpu.memory_space<vmem>>, vector<1x128xf32>
    %2 = vector.broadcast %1 : vector<1x128xf32> to vector<16x128xf32>
    %3 = arith.mulf %0, %2 : vector<16x128xf32>
    %c0_3 = arith.constant 0 : index
    %c0_4 = arith.constant 0 : index
    %4 = vector.load %arg4[%c0_3, %c0_4] : memref<1x128xf32, #tpu.memory_space<vmem>>, vector<1x128xf32>
    %5 = vector.broadcast %4 : vector<1x128xf32> to vector<16x128xf32>
    %6 = arith.addf %3, %5 : vector<16x128xf32>
    %cst = arith.constant 0.000000e+00 : f32
    %7 = vector.broadcast %cst : f32 to vector<16x128xf32>
    %8 = arith.cmpf oge, %6, %7 : vector<16x128xf32>
    %cst_5 = arith.constant 2.000000e-01 : f32
    %9 = vector.broadcast %cst_5 : f32 to vector<16x128xf32>
    %10 = arith.mulf %9, %6 : vector<16x128xf32>
    %11 = arith.select %8, %6, %10 : vector<16x128xi1>, vector<16x128xf32>
    %c0_6 = arith.constant 0 : index
    %c0_7 = arith.constant 0 : index
    %12 = vector.load %arg5[%c0_6, %c0_7] : memref<16x128xf32, #tpu.memory_space<vmem>>, vector<16x128xf32>
    tpu.vector_store %arg5[%c0_6, %c0_7], %11 {strides = array<i32>} : memref<16x128xf32, #tpu.memory_space<vmem>>, vector<16x128xf32>,
    return
  }
  func.func @transform_0(%arg0: i32, %arg1: i32) -> (i32, i32) {
    %c0_i32 = arith.constant 0 : i32
    return %arg0, %arg1 : i32, i32
  }
  func.func @transform_1(%arg0: i32, %arg1: i32) -> (i32, i32) {
    %c0_i32 = arith.constant 0 : i32
    %c0_i32_0 = arith.constant 0 : i32
    return %c0_i32, %arg1 : i32, i32
  }
  func.func @transform_2(%arg0: i32, %arg1: i32) -> (i32, i32) {
    %c0_i32 = arith.constant 0 : i32
    %c0_i32_0 = arith.constant 0 : i32
    return %c0_i32, %arg1 : i32, i32
  }
  func.func @transform_3(%arg0: i32, %arg1: i32) -> (i32, i32) {
    %c0_i32 = arith.constant 0 : i32
    return %arg0, %arg1 : i32, i32
  }
}

module attributes {stable_mosaic.version = 11 : i64} {
  func.func @_fc_matvec_kernel(%arg0: i32, %arg1: memref<8x128xf32, #tpu.memory_space<vmem>>, %arg2: memref<1x128xf32, #tpu.memory_space<vmem>>, %arg3: memref<8x1xf32, #tpu.memory_space<vmem>>, %arg4: memref<8x1xf32, #tpu.memory_space<vmem>>) attributes {dimension_semantics = [#tpu.dimension_semantics<arbitrary>], iteration_bounds = array<i64: 1>, scalar_prefetch = 0 : i64, scratch_operands = 1 : i64, tpu.core_type = #tpu.core_type<tc>, window_params = [{transform_indices = @transform_0, window_bounds = array<i64: 8, 128>}, {transform_indices = @transform_1, window_bounds = array<i64: 1, 128>}, {pipeline_mode = #tpu.pipeline_mode<synchronous>, transform_indices = @transform_2, window_bounds = array<i64: 8, 1>}]} {
    %c0_i32 = arith.constant 0 : i32
    %0 = arith.cmpi eq, %arg0, %c0_i32 : i32
    %1 = arith.extui %0 : i1 to i32
    %c0_i32_0 = arith.constant 0 : i32
    %2 = arith.cmpi ne, %1, %c0_i32_0 : i32
    scf.if %2 {
      %cst_10 = arith.constant 0.000000e+00 : f32
      %15 = vector.broadcast %cst_10 : f32 to vector<8x1xf32>
      %c0_11 = arith.constant 0 : index
      %c0_12 = arith.constant 0 : index
      %16 = vector.load %arg4[%c0_11, %c0_12] : memref<8x1xf32, #tpu.memory_space<vmem>>, vector<8x1xf32>
      tpu.vector_store %arg4[%c0_11, %c0_12], %15 {strides = array<i32>} : memref<8x1xf32, #tpu.memory_space<vmem>>, vector<8x1xf32>,
    } else {
    }
    %c0 = arith.constant 0 : index
    %c0_1 = arith.constant 0 : index
    %3 = vector.load %arg4[%c0, %c0_1] : memref<8x1xf32, #tpu.memory_space<vmem>>, vector<8x1xf32>
    %c0_2 = arith.constant 0 : index
    %c0_3 = arith.constant 0 : index
    %4 = vector.load %arg1[%c0_2, %c0_3] : memref<8x128xf32, #tpu.memory_space<vmem>>, vector<8x128xf32>
    %c0_4 = arith.constant 0 : index
    %c0_5 = arith.constant 0 : index
    %5 = vector.load %arg2[%c0_4, %c0_5] : memref<1x128xf32, #tpu.memory_space<vmem>>, vector<1x128xf32>
    %6 = vector.broadcast %5 : vector<1x128xf32> to vector<8x128xf32>
    %7 = arith.mulf %4, %6 : vector<8x128xf32>
    %cst = arith.constant dense<0.000000e+00> : vector<8xf32>
    %8 = vector.multi_reduction <add>, %7, %cst [1] : vector<8x128xf32> to vector<8xf32>
    %9 = vector.shape_cast %8 : vector<8xf32> to vector<8x1xf32>
    %10 = arith.addf %3, %9 : vector<8x1xf32>
    %c0_6 = arith.constant 0 : index
    %c0_7 = arith.constant 0 : index
    %11 = vector.load %arg4[%c0_6, %c0_7] : memref<8x1xf32, #tpu.memory_space<vmem>>, vector<8x1xf32>
    tpu.vector_store %arg4[%c0_6, %c0_7], %10 {strides = array<i32>} : memref<8x1xf32, #tpu.memory_space<vmem>>, vector<8x1xf32>,
    %c0_i32_8 = arith.constant 0 : i32
    %12 = arith.cmpi eq, %arg0, %c0_i32_8 : i32
    %13 = arith.extui %12 : i1 to i32
    %c0_i32_9 = arith.constant 0 : i32
    %14 = arith.cmpi ne, %13, %c0_i32_9 : i32
    scf.if %14 {
      %c0_10 = arith.constant 0 : index
      %c0_11 = arith.constant 0 : index
      %15 = vector.load %arg4[%c0_10, %c0_11] : memref<8x1xf32, #tpu.memory_space<vmem>>, vector<8x1xf32>
      %c0_12 = arith.constant 0 : index
      %c0_13 = arith.constant 0 : index
      %16 = vector.load %arg3[%c0_12, %c0_13] : memref<8x1xf32, #tpu.memory_space<vmem>>, vector<8x1xf32>
      tpu.vector_store %arg3[%c0_12, %c0_13], %15 {strides = array<i32>} : memref<8x1xf32, #tpu.memory_space<vmem>>, vector<8x1xf32>,
    } else {
    }
    return
  }
  func.func @transform_0(%arg0: i32) -> (i32, i32) {
    %c0_i32 = arith.constant 0 : i32
    %c0_i32_0 = arith.constant 0 : i32
    return %c0_i32, %arg0 : i32, i32
  }
  func.func @transform_1(%arg0: i32) -> (i32, i32) {
    %c0_i32 = arith.constant 0 : i32
    %c0_i32_0 = arith.constant 0 : i32
    return %c0_i32, %arg0 : i32, i32
  }
  func.func @transform_2(%arg0: i32) -> (i32, i32) {
    %c0_i32 = arith.constant 0 : i32
    %c0_i32_0 = arith.constant 0 : i32
    %c0_i32_1 = arith.constant 0 : i32
    return %c0_i32, %c0_i32_0 : i32, i32
  }
}

</mosaic_0001>

<bundles_post_ra>
// kernel: ecg_discriminator_forward.8
= control target key start
LH: loop header
LB: loop body
LE: loop exit
PB: predicated region body
PF: predicated region fallthrough
CT: control target
= control target key end

     0   :  { %s318_s1 = inlined_call_operand.vmem [shape: bf16[128,128], index: 1, kind: input, shape index: {}]   ;;  %s319_s0 = inlined_call_operand.vmem [shape: bf16[32,128], index: 0, kind: input, shape index: {}]   ;;  %s320_s2 = inlined_call_operand.vmem [shape: f32[1,128], index: 2, kind: input, shape index: {}]   ;;  %s321_s3 = inlined_call_operand.vmem [shape: f32[32,128], index: 3, kind: output, shape index: {}]  }
   0x1   :  { %v243_v0 = vld [vmem:[%s318_s1] sm:$0xff]   ;;  %v244_v1 = vld [vmem:[%s318_s1 + $0x8] sm:$0xff]   ;;  %v245_v2 = vld [vmem:[%s318_s1 + $0x10] sm:$0xff]  }
   0x2   :  { %223 = vmatprep.subr.bf16.mxu0 %v243_v0  ;;  %v246_v3 = vld [vmem:[%s318_s1 + $0x18] sm:$0xff]   ;;  %v251_v4 = vld [vmem:[%s319_s0] sm:$0xff]   ;;  %v248_v6 = vld [vmem:[%s318_s1 + $0x28] sm:$0xff]  }
   0x3   :  { %224 = vmatpush3.bf16.msra.mxu0 %v243_v0  ;;  %239 = vmatprep.mubr.bf16.mxu0 %v251_v4  ;;  %v247_v5 = vld [vmem:[%s318_s1 + $0x20] sm:$0xff]   ;;  %v249_v7 = vld [vmem:[%s318_s1 + $0x30] sm:$0xff]   ;;  %v250_v8 = vld [vmem:[%s318_s1 + $0x38] sm:$0xff]  }
   0x4   :  { %225 = vmatprep.subr.bf16.mxu0 %v244_v1  ;;  %v252_v9 = vld [vmem:[%s319_s0 + $0x8] sm:$0xff]   ;;  %v212_v10 = vld [vmem:[%s320_s2] ss:$0 sm:$0xff] }
   0x7   :  { %226 = vmatpush3.bf16.msra.mxu0 %v244_v1 }
   0x8   :  { %227 = vmatprep.subr.bf16.mxu0 %v245_v2 }
   0xb   :  { %228 = vmatpush3.bf16.msra.mxu0 %v245_v2 }
   0xc   :  { %229 = vmatprep.subr.bf16.mxu0 %v246_v3 }
   0xf   :  { %230 = vmatpush3.bf16.msra.mxu0 %v246_v3 }
  0x10   :  { %231 = vmatprep.subr.bf16.mxu0 %v247_v5 }
  0x13   :  { %232 = vmatpush3.bf16.msra.mxu0 %v247_v5 }
  0x14   :  { %233 = vmatprep.subr.bf16.mxu0 %v248_v6 }
  0x17   :  { %234 = vmatpush3.bf16.msra.mxu0 %v248_v6 }
  0x18   :  { %235 = vmatprep.subr.bf16.mxu0 %v249_v7 }
  0x1b   :  { %236 = vmatpush3.bf16.msra.mxu0 %v249_v7 }
  0x1c   :  { %237 = vmatprep.subr.bf16.mxu0 %v250_v8 }
  0x1f   :  { %238 = vmatpush3.bf16.msra.mxu0 %v250_v8 }
  0x22   :  { %240 = vmatmul.mubr.bf16.vlgmr.msra.gmra.mrb[0].mxu0 %v252_v9 }
  0xf5   :  { %v241_v11 = vpop.f32.mrb[0].mxu0 }
  0xf6   :  { %v180_v12 = vadd.f32 %v241_v11, %v212_v10  ;;  %v141_v13 = vpop.f32.mrb[1].mxu0 }
  0xf7   :  { %v178_v14 = vadd.f32 %v212_v10, %v141_v13  ;;  %v242_v15 = vpop.f32.mrb[2].mxu0 }
  0xf8   :  { %vm184_vm0 = vcmp.ge.f32.partialorder %v180_v12, 0.0  ;;  %v188_v16 = vmul.f32 0.2, %v180_v12  ;;  %v181_v17 = vadd.f32 %v242_v15, %v212_v10  ;;  %v144_v18 = vpop.f32.mrb[3].mxu0 }
  0xf9   :  { %vm182_vm1 = vcmp.ge.f32.partialorder %v178_v14, 0.0  ;;  %v186_v19 = vmul.f32 0.2, %v178_v14  ;;  %v179_v20 = vadd.f32 %v212_v10, %v144_v18 }
  0xfa   :  { %v192_v21 = vsel %vm184_vm0, %v180_v12, %v188_v16  ;;  %vm185_vm2 = vcmp.ge.f32.partialorder %v181_v17, 0.0  ;;  %v189_v22 = vmul.f32 0.2, %v181_v17 }
  0xfb   :  { %196 = vst [vmem:[%s321_s3 + $0x10] sm:$0xff] %v192_v21  ;;  %v190_v23 = vsel %vm182_vm1, %v178_v14, %v186_v19  ;;  %vm183_vm3 = vcmp.ge.f32.partialorder %v179_v20, 0.0  ;;  %v187_v24 = vmul.f32 0.2, %v179_v20 }
  0xfc   :  { %194 = vst [vmem:[%s321_s3] sm:$0xff] %v190_v23  ;;  %v193_v25 = vsel %vm185_vm2, %v181_v17, %v189_v22 }
  0xfd   :  { %197 = vst [vmem:[%s321_s3 + $0x18] sm:$0xff] %v193_v25  ;;  %v191_v26 = vsel %vm183_vm3, %v179_v20, %v187_v24 }
  0xfe   :  { %195 = vst [vmem:[%s321_s3 + $0x8] sm:$0xff] %v191_v26 }

// kernel: ecg_discriminator_forward.10
= control target key start
LH: loop header
LB: loop body
LE: loop exit
PB: predicated region body
PF: predicated region fallthrough
CT: control target
= control target key end

     0   :  { %s86_s0 = inlined_call_operand.vmem [shape: f32[16,128], index: 0, kind: input, shape index: {}]   ;;  %s87_s1 = inlined_call_operand.vmem [shape: f32[1,128], index: 1, kind: input, shape index: {}]   ;;  %s88_s2 = inlined_call_operand.vmem [shape: f32[1,128], index: 2, kind: input, shape index: {}]   ;;  %s89_s3 = inlined_call_operand.vmem [shape: f32[16,128], index: 3, kind: output, shape index: {}]  }
   0x1   :  { %v14_v0 = vld [vmem:[%s86_s0] sm:$0xff]  ;;  %v15_v4 = vld [vmem:[%s86_s0 + $0x8] sm:$0xff] }
   0x2   :  { %v46_v1 = vld [vmem:[%s87_s1] ss:$0 sm:$0xff] }
   0x3   :  { %v47_v2 = vld [vmem:[%s88_s2] ss:$0 sm:$0xff]  ;;  %v23_v3 = vmul.f32 %v46_v1, %v14_v0  ;;  %v24_v5 = vmul.f32 %v46_v1, %v15_v4 }
   0x5   :  { %v32_v6 = vadd.f32 %v47_v2, %v23_v3  ;;  %v33_v7 = vadd.f32 %v47_v2, %v24_v5 }
   0x7   :  { %vm34_vm0 = vcmp.ge.f32.partialorder %v32_v6, 0.0  ;;  %v36_v8 = vmul.f32 0.2, %v32_v6  ;;  %vm35_vm1 = vcmp.ge.f32.partialorder %v33_v7, 0.0  ;;  %v37_v9 = vmul.f32 0.2, %v33_v7 }
   0x9   :  { %v38_v10 = vsel %vm34_vm0, %v32_v6, %v36_v8  ;;  %v39_v11 = vsel %vm35_vm1, %v33_v7, %v37_v9 }
   0xa   :  { %40 = vst [vmem:[%s89_s3] sm:$0xff] %v38_v10  ;;  %41 = vst [vmem:[%s89_s3 + $0x8] sm:$0xff] %v39_v11 }

// kernel: ecg_discriminator_forward.9
= control target key start
LH: loop header
LB: loop body
LE: loop exit
PB: predicated region body
PF: predicated region fallthrough
CT: control target
= control target key end

     0   :  { %v226_v0 = vmov 0.0   ;;  %vm227_vm0 = vmmov 0   ;;  %s292_s1 = inlined_call_operand.vmem [shape: bf16[128,128], index: 1, kind: input, shape index: {}]   ;;  %s293_s0 = inlined_call_operand.vmem [shape: bf16[16,128], index: 0, kind: input, shape index: {}]   ;;  %s294_s2 = inlined_call_operand.vmem [shape: f32[16,128], index: 2, kind: output, shape index: {0}]   ;;  %s295_s3 = inlined_call_operand.vmem [shape: f32[1,8,128], index: 3, kind: output, shape index: {1}]   ;;  %s296_s4 = inlined_call_operand.vmem [shape: f32[1,8,128], index: 4, kind: output, shape index: {2}]  }
   0x1   :  { %195 = vmatprep.subr.bf16.mxu0 %v226_v0  ;;  %v217_v1 = vld [vmem:[%s292_s1] sm:$0xff]   ;;  %211 = vmatprep.mubr.msk.bf16.mxu0 %vm227_vm0, %v226_v0  ;;  %v218_v2 = vld [vmem:[%s292_s1 + $0x8] sm:$0xff]   ;;  %v219_v3 = vld [vmem:[%s292_s1 + $0x10] sm:$0xff]  }
   0x2   :  { %196 = vmatpush3.bf16.msra.mxu0 %v217_v1  ;;  %v220_v4 = vld [vmem:[%s292_s1 + $0x18] sm:$0xff]   ;;  %v221_v5 = vld [vmem:[%s292_s1 + $0x20] sm:$0xff]   ;;  %v222_v6 = vld [vmem:[%s292_s1 + $0x28] sm:$0xff]  }
   0x3   :  { %197 = vmatprep.subr.bf16.mxu0 %v226_v0  ;;  %v223_v7 = vld [vmem:[%s292_s1 + $0x30] sm:$0xff]   ;;  %v224_v8 = vld [vmem:[%s292_s1 + $0x38] sm:$0xff]   ;;  %v225_v9 = vld [vmem:[%s293_s0] sm:$0xff]  }
   0x6   :  { %198 = vmatpush3.bf16.msra.mxu0 %v218_v2 }
   0x7   :  { %199 = vmatprep.subr.bf16.mxu0 %v226_v0 }
   0xa   :  { %200 = vmatpush3.bf16.msra.mxu0 %v219_v3 }
   0xb   :  { %201 = vmatprep.subr.bf16.mxu0 %v226_v0 }
   0xe   :  { %202 = vmatpush3.bf16.msra.mxu0 %v220_v4 }
   0xf   :  { %203 = vmatprep.subr.bf16.mxu0 %v226_v0 }
  0x12   :  { %204 = vmatpush3.bf16.msra.mxu0 %v221_v5 }
  0x13   :  { %205 = vmatprep.subr.bf16.mxu0 %v226_v0 }
  0x16   :  { %206 = vmatpush3.bf16.msra.mxu0 %v222_v6 }
  0x17   :  { %207 = vmatprep.subr.bf16.mxu0 %v226_v0 }
  0x1a   :  { %208 = vmatpush3.bf16.msra.mxu0 %v223_v7 }
  0x1b   :  { %209 = vmatprep.subr.bf16.mxu0 %v226_v0 }
  0x1e   :  { %210 = vmatpush3.bf16.msra.mxu0 %v224_v8 }
  0x21   :  { %212 = vmatmul.mubr.bf16.vlgmr.msra.gmra.mrb[0].mxu0 %v225_v9 }
  0xf4   :  { %v129_v10 = vpop.f32.mrb[0].mxu0 }
  0xf5   :  { %145 = vst [vmem:[%s294_s2] sm:$0xff] %v129_v10  ;;  %v213_v11 = vpop.f32.mrb[1].mxu0  ;;  %v154_v13 = vmul.f32 %v129_v10, %v129_v10 }
  0xf6   :  { %v132_v12 = vpop.f32.mrb[2].mxu0 }
  0xf7   :  { %146 = vst [vmem:[%s294_s2 + $0x8] sm:$0xff] %v132_v12  ;;  %v147_v14 = vadd.f32 %v132_v12, %v129_v10  ;;  %v155_v15 = vmul.f32 %v132_v12, %v132_v12  ;;  %v214_v16 = vpop.f32.mrb[3].mxu0 }
  0xf9   :  { %v148_v17 = vrot.slane %v147_v14, 4  ;;  %v156_v18 = vadd.f32 %v155_v15, %v154_v13 }
  0xfb   :  { %v149_v19 = vadd.f32 %v148_v17, %v147_v14  ;;  %v157_v20 = vrot.slane %v156_v18, 4 }
  0xfd   :  { %v150_v21 = vrot.slane %v149_v19, 2  ;;  %v158_v22 = vadd.f32 %v157_v20, %v156_v18 }
  0xff   :  { %v151_v23 = vadd.f32 %v150_v21, %v149_v19  ;;  %v159_v24 = vrot.slane %v158_v22, 2 }
 0x101   :  { %v152_v25 = vrot.slane %v151_v23, 1  ;;  %v160_v26 = vadd.f32 %v159_v24, %v158_v22 }
 0x103   :  { %v153_v27 = vadd.f32 %v152_v25, %v151_v23  ;;  %v161_v28 = vrot.slane %v160_v26, 1 }
 0x105   :  { %v162_v29 = vadd.f32 %v161_v28, %v160_v26  ;;  %163 = vst [vmem:[%s295_s3] sm:$0xff] %v153_v27 }
 0x107   :  { %164 = vst [vmem:[%s296_s4] sm:$0xff] %v162_v29 }

// kernel: ecg_discriminator_forward.15
= control target key start
LH: loop header
LB: loop body
LE: loop exit
PB: predicated region body
PF: predicated region fallthrough
CT: control target
= control target key end

     0   :  { %vm15_vm0 = vcmask 7168   ;;  %v43_v2 = vmov 0.0   ;;  %s68_s0 = inlined_call_operand.vmem [shape: f32[8,128], index: 0, kind: input, shape index: {}]   ;;  %s69_s1 = inlined_call_operand.vmem [shape: f32[1,128], index: 1, kind: input, shape index: {}]   ;;  %s70_s2 = inlined_call_operand.vmem [shape: f32[8,1], index: 2, kind: output, shape index: {}]  }
   0x1   :  { %v18_v0 = vld [vmem:[%s68_s0] sm:$0xff]  ;;  %16 = vst.msk [vmem:[#allocation2] sm:$0xff] %vm15_vm0, %v43_v2 }
   0x2   :  { %v41_v1 = vld [vmem:[%s69_s1] ss:$0 sm:$0xff] }
   0x3   :  { %v26_v3 = vmul.f32 %v41_v1, %v18_v0 }
   0x5   :  { %27 = vadd.xlane.f32.xlu0 %v26_v3 }
   0x8   :  { %v17_v4 = vld [vmem:[#allocation2] sm:$0xff] }
  0x92   :  { %v28_v5 = vpop.xlane.xlu0 %27 }
  0x93   :  { %v29_v6 = vadd.f32 %v28_v5, %v17_v4 }
  0x95   :  { %31 = vst.msk [vmem:[#allocation2] sm:$0xff] %vm15_vm0, %v29_v6 }
  0x9c   :  { %v35_v7 = vld [vmem:[#allocation2] sm:$0xff] }
  0x9d   :  { %36 = vst.msk [vmem:[%s70_s2] sm:$0xff] %vm15_vm0, %v35_v7 }

</bundles_post_ra>
